<compile_context>
chip_gen: v7x
topology: tpu7x:2x2x1
jax: 0.10.0
libtpu: 0.0.40
codegen_flags: <defaults>
</compile_context>

<pallas_src>
import jax
import jax.numpy as jnp
from jax.experimental import pallas as pl
from jax.experimental.pallas import tpu as pltpu


# ---------------------------------------------------------------------------
# Pallas kernel: one GCN layer as a tiled K-reduction over A_hat with a
# projection/bias/ReLU epilogue.
#   acc(i)  = sum_k  adj[i, k] @ act[k, :]        (f32 accumulator in VMEM scratch)
#   out(i)  = relu?( acc(i) @ W + b )             (only at k == last)
# ---------------------------------------------------------------------------
def _make_gcn_layer_kernel(apply_relu):
    def kernel(adj_ref, act_ref, w_ref, b_ref, out_ref, acc_ref):
        k = pl.program_id(1)

        @pl.when(k == 0)
        def _init():
            acc_ref[...] = jnp.zeros_like(acc_ref)

        acc_ref[...] += jnp.dot(
            adj_ref[...], act_ref[...], preferred_element_type=jnp.float32
        )

        @pl.when(k == pl.num_programs(1) - 1)
        def _epilogue():
            y = jnp.dot(
                acc_ref[...].astype(jnp.bfloat16),
                w_ref[...],
                preferred_element_type=jnp.float32,
            ) + b_ref[...]
            if apply_relu:
                y = jnp.maximum(y, 0.0)
            out_ref[...] = y.astype(out_ref.dtype)

    return kernel


def gcn_agg_project(adj, act, w, b, *, apply_relu, out_dtype, tm, tk):
    """out = act?( (adj @ act) @ w + b ), tiled over (row tiles, K tiles)."""
    n = adj.shape[0]            # padded node count, multiple of tm and tk
    f = act.shape[1]            # padded lane width (multiple of 128)
    assert n % tm == 0 and n % tk == 0 and f % 128 == 0
    grid = (n // tm, n // tk)

    return pl.pallas_call(
        _make_gcn_layer_kernel(apply_relu),
        out_shape=jax.ShapeDtypeStruct((n, f), out_dtype),
        grid_spec=pltpu.PrefetchScalarGridSpec(
            num_scalar_prefetch=0,
            grid=grid,
            in_specs=[
                pl.BlockSpec((tm, tk), lambda i, k: (i, k)),  # A_hat tile (streamed)
                pl.BlockSpec((tk, f), lambda i, k: (k, 0)),   # activation tile
                pl.BlockSpec((f, f), lambda i, k: (0, 0)),    # projection W (resident)
                pl.BlockSpec((1, f), lambda i, k: (0, 0)),    # bias (resident)
            ],
            out_specs=pl.BlockSpec((tm, f), lambda i, k: (i, 0)),
            scratch_shapes=[pltpu.VMEM((tm, f), jnp.float32)],
        ),
        compiler_params=pltpu.CompilerParams(
            dimension_semantics=("parallel", "arbitrary"),
            vmem_limit_bytes=32 * 1024 * 1024,
        ),
    )(adj, act, w, b)


# ---------------------------------------------------------------------------
# Plain-JAX glue: manifold logmap0, adjacency normalization, padding, init.
# ---------------------------------------------------------------------------
# TODO(synk): the real `pretrained_model` and its manifold classes are not part of the
# provided source; the standard kappa-stereographic logmap0 convention is used
# (artanh for the hyperbolic component, arctan for the spherical component).
def logmap0_hyperbolic(x, eps=1e-7):
    norm = jnp.linalg.norm(x, axis=-1, keepdims=True)
    clamped = jnp.clip(norm, eps, 1.0 - 1e-5)
    return jnp.arctanh(clamped) * x / jnp.maximum(norm, eps)


def logmap0_sphere(x, eps=1e-7):
    norm = jnp.linalg.norm(x, axis=-1, keepdims=True)
    return jnp.arctan(norm) * x / jnp.maximum(norm, eps)


def normalized_adjacency(edge_index, num_nodes):
    src, dst = edge_index[0], edge_index[1]
    adj = jnp.zeros((num_nodes, num_nodes), jnp.float32)
    adj = adj.at[dst, src].set(1.0)                     # messages flow src -> dst
    adj = adj + jnp.eye(num_nodes, dtype=jnp.float32)   # add self loops
    deg = jnp.sum(adj, axis=1)
    d_inv_sqrt = jnp.where(deg > 0, 1.0 / jnp.sqrt(deg), 0.0)
    return adj * d_inv_sqrt[:, None] * d_inv_sqrt[None, :]


def glorot(key, fan_in, fan_out):
    s = jnp.sqrt(6.0 / (fan_in + fan_out))
    return jax.random.uniform(key, (fan_in, fan_out), jnp.float32, -s, s)


def _round_up(x, m):
    return ((x + m - 1) // m) * m


def _pad2d(a, rows, cols, dtype):
    out = jnp.zeros((rows, cols), dtype)
    return out.at[: a.shape[0], : a.shape[1]].set(a.astype(dtype))


def _pick_tiles(n):
    """Largest square tile (128..512) that doesn't over-pad small graphs."""
    n128 = _round_up(n, 128)
    t = min(512, n128)
    return t, t


def _build_padded_operands(data_x, x_H, x_S, edge_index, params, tm, tk):
    n = data_x.shape[0]
    num_cls = params["w2"].shape[1]

    x_h = logmap0_hyperbolic(x_H)
    x_s = logmap0_sphere(x_S)
    x = jnp.concatenate([data_x, x_h, x_s], axis=-1).astype(jnp.float32)
    adj = normalized_adjacency(edge_index, n)

    in_dim = x.shape[1]
    hidden = params["w1"].shape[1]
    # One lane-padded width shared by features / hidden / classes (all <= 128 here).
    f = _round_up(max(in_dim, hidden, num_cls, 128), 128)
    n_pad = _round_up(n, max(tm, tk))

    ops = {
        "x":   _pad2d(x, n_pad, f, jnp.bfloat16),
        "adj": _pad2d(adj, n_pad, n_pad, jnp.bfloat16),
        "w1":  _pad2d(params["w1"], f, f, jnp.bfloat16),
        "b1":  _pad2d(params["b1"], 1, f, jnp.float32),
        "w2":  _pad2d(params["w2"], f, f, jnp.bfloat16),
        "b2":  _pad2d(params["b2"], 1, f, jnp.float32),
    }
    return ops, n, num_cls


def node_cls_head_forward(data_x, x_H, x_S, edge_index, params):
    tm, tk = _pick_tiles(data_x.shape[0])
    ops, n, num_cls = _build_padded_operands(data_x, x_H, x_S, edge_index, params, tm, tk)
    # Layer 1: h1 = relu( (A_hat @ x) @ W1 + b1 )   (bf16 output feeds next MXU pass)
    h1 = gcn_agg_project(ops["adj"], ops["x"], ops["w1"], ops["b1"],
                         apply_relu=True, out_dtype=jnp.bfloat16, tm=tm, tk=tk)
    # Layer 2: o  =       (A_hat @ h1) @ W2 + b2
    o = gcn_agg_project(ops["adj"], h1, ops["w2"], ops["b2"],
                        apply_relu=False, out_dtype=jnp.float32, tm=tm, tk=tk)
    return o[:n, :num_cls]


node_cls_head_forward_jit = jax.jit(node_cls_head_forward)


# ---------------------------------------------------------------------------
# References: (a) numerics-matched (same bf16 casts, f32 accumulation),
#             (b) pure-f32 semantic reference (loose tolerance vs bf16 kernel).
# ---------------------------------------------------------------------------
def matched_reference(data_x, x_H, x_S, edge_index, params):
    tm, tk = _pick_tiles(data_x.shape[0])
    ops, n, num_cls = _build_padded_operands(data_x, x_H, x_S, edge_index, params, tm, tk)
    f32 = jnp.float32
    agg1 = jnp.dot(ops["adj"], ops["x"], preferred_element_type=f32)
    h1 = jnp.maximum(
        jnp.dot(agg1.astype(jnp.bfloat16), ops["w1"], preferred_element_type=f32)
        + ops["b1"], 0.0).astype(jnp.bfloat16)
    agg2 = jnp.dot(ops["adj"], h1, preferred_element_type=f32)
    o = jnp.dot(agg2.astype(jnp.bfloat16), ops["w2"], preferred_element_type=f32) + ops["b2"]
    return o[:n, :num_cls]


def f32_reference(data_x, x_H, x_S, edge_index, params):
    x_h = logmap0_hyperbolic(x_H)
    x_s = logmap0_sphere(x_S)
    x = jnp.concatenate([data_x, x_h, x_s], axis=-1).astype(jnp.float32)
    adj = normalized_adjacency(edge_index, data_x.shape[0])
    h = jnp.maximum(adj @ (x @ params["w1"]) + params["b1"], 0.0)
    return adj @ (h @ params["w2"]) + params["b2"]


if __name__ == "__main__":
    N = 16            # nodes
    DX, DH, DS = 8, 8, 8
    IN_DIM = DX + DH + DS
    HIDDEN = 32
    NUM_CLS = 4

    key = jax.random.PRNGKey(0)
    k_x, k_h, k_s, k_w1, k_w2 = jax.random.split(key, 5)

    # data.x and stand-in pretrained embeddings (x_E is unused by the head forward).
    data_x = jax.random.normal(k_x, (N, DX), jnp.float32)
    x_H = 0.3 * jax.random.normal(k_h, (N, DH), jnp.float32)  # inside unit ball
    x_S = jax.random.normal(k_s, (N, DS), jnp.float32)

    # deterministic ring graph (both directions), edge_index shape (2, 2N)
    idx = jnp.arange(N)
    src = jnp.concatenate([idx, (idx + 1) % N])
    dst = jnp.concatenate([(idx + 1) % N, idx])
    edge_index = jnp.stack([src, dst], axis=0)

    params = {
        "w1": glorot(k_w1, IN_DIM, HIDDEN),
        "b1": jnp.zeros((1, HIDDEN), jnp.float32),
        "w2": glorot(k_w2, HIDDEN, NUM_CLS),
        "b2": jnp.zeros((1, NUM_CLS), jnp.float32),
    }

    out = node_cls_head_forward_jit(data_x, x_H, x_S, edge_index, params)
    out = jax.block_until_ready(out)
    assert out.shape == (N, NUM_CLS)

    # Tight check against the numerics-matched (bf16-input, f32-accum) reference.
    ref_m = matched_reference(data_x, x_H, x_S, edge_index, params)
    assert jnp.allclose(out, ref_m, atol=2e-3, rtol=2e-3), "mismatch vs matched reference"

    # Loose sanity check against the pure-f32 reference (bf16 quantization slack).
    ref_f = f32_reference(data_x, x_H, x_S, edge_index, params)
    assert jnp.allclose(out, ref_f, atol=5e-2, rtol=5e-2), "mismatch vs f32 reference"

    print("KERNEL_OK")
</pallas_src>

<mosaic_0001>
module attributes {stable_mosaic.version = 11 : i64} {
  func.func @kernel(%arg0: i32, %arg1: i32, %arg2: memref<128x128xbf16, #tpu.memory_space<vmem>>, %arg3: memref<128x128xbf16, #tpu.memory_space<vmem>>, %arg4: memref<128x128xbf16, #tpu.memory_space<vmem>>, %arg5: memref<1x128xf32, #tpu.memory_space<vmem>>, %arg6: memref<128x128xf32, #tpu.memory_space<vmem>>, %arg7: memref<128x128xf32, #tpu.memory_space<vmem>>) attributes {dimension_semantics = [#tpu.dimension_semantics<parallel>, #tpu.dimension_semantics<arbitrary>], iteration_bounds = array<i64: 1, 1>, scalar_prefetch = 0 : i64, scratch_operands = 1 : i64, tpu.core_type = #tpu.core_type<tc>, window_params = [{transform_indices = @transform_0, window_bounds = array<i64: 128, 128>}, {transform_indices = @transform_1, window_bounds = array<i64: 128, 128>}, {pipeline_mode = #tpu.pipeline_mode<synchronous>, transform_indices = @transform_2, window_bounds = array<i64: 128, 128>}, {pipeline_mode = #tpu.pipeline_mode<synchronous>, transform_indices = @transform_3, window_bounds = array<i64: 1, 128>}, {transform_indices = @transform_4, window_bounds = array<i64: 128, 128>}]} {
    %c0_i32 = arith.constant 0 : i32
    %0 = arith.cmpi eq, %arg1, %c0_i32 : i32
    %1 = arith.extui %0 : i1 to i32
    %c0_i32_0 = arith.constant 0 : i32
    %2 = arith.cmpi ne, %1, %c0_i32_0 : i32
    scf.if %2 {
      %cst_10 = arith.constant 0.000000e+00 : f32
      %12 = vector.broadcast %cst_10 : f32 to vector<128x128xf32>
      %c0_11 = arith.constant 0 : index
      %c0_12 = arith.constant 0 : index
      %13 = vector.load %arg7[%c0_11, %c0_12] : memref<128x128xf32, #tpu.memory_space<vmem>>, vector<128x128xf32>
      tpu.vector_store %arg7[%c0_11, %c0_12], %12 {strides = array<i32>} : memref<128x128xf32, #tpu.memory_space<vmem>>, vector<128x128xf32>,
    } else {
    }
    %c0 = arith.constant 0 : index
    %c0_1 = arith.constant 0 : index
    %3 = vector.load %arg7[%c0, %c0_1] : memref<128x128xf32, #tpu.memory_space<vmem>>, vector<128x128xf32>
    %c0_2 = arith.constant 0 : index
    %c0_3 = arith.constant 0 : index
    %4 = vector.load %arg2[%c0_2, %c0_3] : memref<128x128xbf16, #tpu.memory_space<vmem>>, vector<128x128xbf16>
    %c0_4 = arith.constant 0 : index
    %c0_5 = arith.constant 0 : index
    %5 = vector.load %arg3[%c0_4, %c0_5] : memref<128x128xbf16, #tpu.memory_space<vmem>>, vector<128x128xbf16>
    %cst = arith.constant dense<0.000000e+00> : vector<128x128xf32>
    %6 = tpu.matmul %4, %5, %cst {dimension_numbers = #tpu.dot_dimension_numbers<[1], [0], [0], [1], [0, 0, 1, 1], [], []>} : vector<128x128xbf16>, vector<128x128xbf16>, vector<128x128xf32> -> vector<128x128xf32>
    %7 = arith.addf %3, %6 : vector<128x128xf32>
    %c0_6 = arith.constant 0 : index
    %c0_7 = arith.constant 0 : index
    %8 = vector.load %arg7[%c0_6, %c0_7] : memref<128x128xf32, #tpu.memory_space<vmem>>, vector<128x128xf32>
    tpu.vector_store %arg7[%c0_6, %c0_7], %7 {strides = array<i32>} : memref<128x128xf32, #tpu.memory_space<vmem>>, vector<128x128xf32>,
    %c0_i32_8 = arith.constant 0 : i32
    %9 = arith.cmpi eq, %arg1, %c0_i32_8 : i32
    %10 = arith.extui %9 : i1 to i32
    %c0_i32_9 = arith.constant 0 : i32
    %11 = arith.cmpi ne, %10, %c0_i32_9 : i32
    scf.if %11 {
      %c0_10 = arith.constant 0 : index
      %c0_11 = arith.constant 0 : index
      %12 = vector.load %arg7[%c0_10, %c0_11] : memref<128x128xf32, #tpu.memory_space<vmem>>, vector<128x128xf32>
      %13 = arith.truncf %12 : vector<128x128xf32> to vector<128x128xbf16>
      %c0_12 = arith.constant 0 : index
      %c0_13 = arith.constant 0 : index
      %14 = vector.load %arg4[%c0_12, %c0_13] : memref<128x128xbf16, #tpu.memory_space<vmem>>, vector<128x128xbf16>
      %cst_14 = arith.constant dense<0.000000e+00> : vector<128x128xf32>
      %15 = tpu.matmul %13, %14, %cst_14 {dimension_numbers = #tpu.dot_dimension_numbers<[1], [0], [0], [1], [0, 0, 1, 1], [], []>} : vector<128x128xbf16>, vector<128x128xbf16>, vector<128x128xf32> -> vector<128x128xf32>
      %c0_15 = arith.constant 0 : index
      %c0_16 = arith.constant 0 : index
      %16 = vector.load %arg5[%c0_15, %c0_16] : memref<1x128xf32, #tpu.memory_space<vmem>>, vector<1x128xf32>
      %17 = vector.broadcast %16 : vector<1x128xf32> to vector<128x128xf32>
      %18 = arith.addf %15, %17 : vector<128x128xf32>
      %c0_17 = arith.constant 0 : index
      %c0_18 = arith.constant 0 : index
      %19 = vector.load %arg6[%c0_17, %c0_18] : memref<128x128xf32, #tpu.memory_space<vmem>>, vector<128x128xf32>
      tpu.vector_store %arg6[%c0_17, %c0_18], %18 {strides = array<i32>} : memref<128x128xf32, #tpu.memory_space<vmem>>, vector<128x128xf32>,
    } else {
    }
    return
  }
  func.func @transform_0(%arg0: i32, %arg1: i32) -> (i32, i32) {
    %c0_i32 = arith.constant 0 : i32
    return %arg0, %arg1 : i32, i32
  }
  func.func @transform_1(%arg0: i32, %arg1: i32) -> (i32, i32) {
    %c0_i32 = arith.constant 0 : i32
    %c0_i32_0 = arith.constant 0 : i32
    return %arg1, %c0_i32 : i32, i32
  }
  func.func @transform_2(%arg0: i32, %arg1: i32) -> (i32, i32) {
    %c0_i32 = arith.constant 0 : i32
    %c0_i32_0 = arith.constant 0 : i32
    %c0_i32_1 = arith.constant 0 : i32
    return %c0_i32, %c0_i32_0 : i32, i32
  }
  func.func @transform_3(%arg0: i32, %arg1: i32) -> (i32, i32) {
    %c0_i32 = arith.constant 0 : i32
    %c0_i32_0 = arith.constant 0 : i32
    %c0_i32_1 = arith.constant 0 : i32
    return %c0_i32, %c0_i32_0 : i32, i32
  }
  func.func @transform_4(%arg0: i32, %arg1: i32) -> (i32, i32) {
    %c0_i32 = arith.constant 0 : i32
    %c0_i32_0 = arith.constant 0 : i32
    return %arg0, %c0_i32 : i32, i32
  }
}

module attributes {stable_mosaic.version = 11 : i64} {
  func.func @kernel(%arg0: i32, %arg1: i32, %arg2: memref<128x128xbf16, #tpu.memory_space<vmem>>, %arg3: memref<128x128xbf16, #tpu.memory_space<vmem>>, %arg4: memref<128x128xbf16, #tpu.memory_space<vmem>>, %arg5: memref<1x128xf32, #tpu.memory_space<vmem>>, %arg6: memref<128x128xbf16, #tpu.memory_space<vmem>>, %arg7: memref<128x128xf32, #tpu.memory_space<vmem>>) attributes {dimension_semantics = [#tpu.dimension_semantics<parallel>, #tpu.dimension_semantics<arbitrary>], iteration_bounds = array<i64: 1, 1>, scalar_prefetch = 0 : i64, scratch_operands = 1 : i64, tpu.core_type = #tpu.core_type<tc>, window_params = [{transform_indices = @transform_0, window_bounds = array<i64: 128, 128>}, {transform_indices = @transform_1, window_bounds = array<i64: 128, 128>}, {pipeline_mode = #tpu.pipeline_mode<synchronous>, transform_indices = @transform_2, window_bounds = array<i64: 128, 128>}, {pipeline_mode = #tpu.pipeline_mode<synchronous>, transform_indices = @transform_3, window_bounds = array<i64: 1, 128>}, {transform_indices = @transform_4, window_bounds = array<i64: 128, 128>}]} {
    %c0_i32 = arith.constant 0 : i32
    %0 = arith.cmpi eq, %arg1, %c0_i32 : i32
    %1 = arith.extui %0 : i1 to i32
    %c0_i32_0 = arith.constant 0 : i32
    %2 = arith.cmpi ne, %1, %c0_i32_0 : i32
    scf.if %2 {
      %cst_10 = arith.constant 0.000000e+00 : f32
      %12 = vector.broadcast %cst_10 : f32 to vector<128x128xf32>
      %c0_11 = arith.constant 0 : index
      %c0_12 = arith.constant 0 : index
      %13 = vector.load %arg7[%c0_11, %c0_12] : memref<128x128xf32, #tpu.memory_space<vmem>>, vector<128x128xf32>
      tpu.vector_store %arg7[%c0_11, %c0_12], %12 {strides = array<i32>} : memref<128x128xf32, #tpu.memory_space<vmem>>, vector<128x128xf32>,
    } else {
    }
    %c0 = arith.constant 0 : index
    %c0_1 = arith.constant 0 : index
    %3 = vector.load %arg7[%c0, %c0_1] : memref<128x128xf32, #tpu.memory_space<vmem>>, vector<128x128xf32>
    %c0_2 = arith.constant 0 : index
    %c0_3 = arith.constant 0 : index
    %4 = vector.load %arg2[%c0_2, %c0_3] : memref<128x128xbf16, #tpu.memory_space<vmem>>, vector<128x128xbf16>
    %c0_4 = arith.constant 0 : index
    %c0_5 = arith.constant 0 : index
    %5 = vector.load %arg3[%c0_4, %c0_5] : memref<128x128xbf16, #tpu.memory_space<vmem>>, vector<128x128xbf16>
    %cst = arith.constant dense<0.000000e+00> : vector<128x128xf32>
    %6 = tpu.matmul %4, %5, %cst {dimension_numbers = #tpu.dot_dimension_numbers<[1], [0], [0], [1], [0, 0, 1, 1], [], []>} : vector<128x128xbf16>, vector<128x128xbf16>, vector<128x128xf32> -> vector<128x128xf32>
    %7 = arith.addf %3, %6 : vector<128x128xf32>
    %c0_6 = arith.constant 0 : index
    %c0_7 = arith.constant 0 : index
    %8 = vector.load %arg7[%c0_6, %c0_7] : memref<128x128xf32, #tpu.memory_space<vmem>>, vector<128x128xf32>
    tpu.vector_store %arg7[%c0_6, %c0_7], %7 {strides = array<i32>} : memref<128x128xf32, #tpu.memory_space<vmem>>, vector<128x128xf32>,
    %c0_i32_8 = arith.constant 0 : i32
    %9 = arith.cmpi eq, %arg1, %c0_i32_8 : i32
    %10 = arith.extui %9 : i1 to i32
    %c0_i32_9 = arith.constant 0 : i32
    %11 = arith.cmpi ne, %10, %c0_i32_9 : i32
    scf.if %11 {
      %c0_10 = arith.constant 0 : index
      %c0_11 = arith.constant 0 : index
      %12 = vector.load %arg7[%c0_10, %c0_11] : memref<128x128xf32, #tpu.memory_space<vmem>>, vector<128x128xf32>
      %13 = arith.truncf %12 : vector<128x128xf32> to vector<128x128xbf16>
      %c0_12 = arith.constant 0 : index
      %c0_13 = arith.constant 0 : index
      %14 = vector.load %arg4[%c0_12, %c0_13] : memref<128x128xbf16, #tpu.memory_space<vmem>>, vector<128x128xbf16>
      %cst_14 = arith.constant dense<0.000000e+00> : vector<128x128xf32>
      %15 = tpu.matmul %13, %14, %cst_14 {dimension_numbers = #tpu.dot_dimension_numbers<[1], [0], [0], [1], [0, 0, 1, 1], [], []>} : vector<128x128xbf16>, vector<128x128xbf16>, vector<128x128xf32> -> vector<128x128xf32>
      %c0_15 = arith.constant 0 : index
      %c0_16 = arith.constant 0 : index
      %16 = vector.load %arg5[%c0_15, %c0_16] : memref<1x128xf32, #tpu.memory_space<vmem>>, vector<1x128xf32>
      %17 = vector.broadcast %16 : vector<1x128xf32> to vector<128x128xf32>
      %18 = arith.addf %15, %17 : vector<128x128xf32>
      %cst_17 = arith.constant 0.000000e+00 : f32
      %19 = vector.broadcast %cst_17 : f32 to vector<128x128xf32>
      %20 = arith.maximumf %18, %19 : vector<128x128xf32>
      %21 = arith.truncf %20 : vector<128x128xf32> to vector<128x128xbf16>
      %c0_18 = arith.constant 0 : index
      %c0_19 = arith.constant 0 : index
      %22 = vector.load %arg6[%c0_18, %c0_19] : memref<128x128xbf16, #tpu.memory_space<vmem>>, vector<128x128xbf16>
      tpu.vector_store %arg6[%c0_18, %c0_19], %21 {strides = array<i32>} : memref<128x128xbf16, #tpu.memory_space<vmem>>, vector<128x128xbf16>,
    } else {
    }
    return
  }
  func.func @transform_0(%arg0: i32, %arg1: i32) -> (i32, i32) {
    %c0_i32 = arith.constant 0 : i32
    return %arg0, %arg1 : i32, i32
  }
  func.func @transform_1(%arg0: i32, %arg1: i32) -> (i32, i32) {
    %c0_i32 = arith.constant 0 : i32
    %c0_i32_0 = arith.constant 0 : i32
    return %arg1, %c0_i32 : i32, i32
  }
  func.func @transform_2(%arg0: i32, %arg1: i32) -> (i32, i32) {
    %c0_i32 = arith.constant 0 : i32
    %c0_i32_0 = arith.constant 0 : i32
    %c0_i32_1 = arith.constant 0 : i32
    return %c0_i32, %c0_i32_0 : i32, i32
  }
  func.func @transform_3(%arg0: i32, %arg1: i32) -> (i32, i32) {
    %c0_i32 = arith.constant 0 : i32
    %c0_i32_0 = arith.constant 0 : i32
    %c0_i32_1 = arith.constant 0 : i32
    return %c0_i32, %c0_i32_0 : i32, i32
  }
  func.func @transform_4(%arg0: i32, %arg1: i32) -> (i32, i32) {
    %c0_i32 = arith.constant 0 : i32
    %c0_i32_0 = arith.constant 0 : i32
    return %arg0, %c0_i32 : i32, i32
  }
}

</mosaic_0001>

<bundles_post_ra>
// kernel: node_cls_head_forward.3
= control target key start
LH: loop header
LB: loop body
LE: loop exit
PB: predicated region body
PF: predicated region fallthrough
CT: control target
= control target key end

     0   :  { %s819_s1 = inlined_call_operand.vmem [shape: bf16[128,128], index: 1, kind: input, shape index: {}]   ;;  %s820_s0 = inlined_call_operand.vmem [shape: bf16[128,128], index: 0, kind: input, shape index: {}]   ;;  %s821_s2 = inlined_call_operand.vmem [shape: bf16[128,128], index: 2, kind: input, shape index: {}]   ;;  %s822_s3 = inlined_call_operand.vmem [shape: f32[1,128], index: 3, kind: input, shape index: {}]   ;;  %s823_s4 = inlined_call_operand.vmem [shape: f32[128,128], index: 4, kind: output, shape index: {}]  }
   0x1   :  { %v647_v0 = vld [vmem:[%s819_s1] sm:$0xff]   ;;  %v648_v1 = vld [vmem:[%s819_s1 + $0x8] sm:$0xff]   ;;  %v649_v2 = vld [vmem:[%s819_s1 + $0x10] sm:$0xff]  }
   0x2   :  { %583 = vmatprep.subr.bf16.mxu0 %v647_v0  ;;  %v650_v3 = vld [vmem:[%s819_s1 + $0x18] sm:$0xff]   ;;  %v655_v4 = vld [vmem:[%s820_s0] sm:$0xff]   ;;  %v652_v6 = vld [vmem:[%s819_s1 + $0x28] sm:$0xff]  }
   0x3   :  { %584 = vmatpush3.bf16.msra.mxu0 %v647_v0  ;;  %599 = vmatprep.mubr.bf16.mxu0 %v655_v4  ;;  %v651_v5 = vld [vmem:[%s819_s1 + $0x20] sm:$0xff]   ;;  %v664_v8 = vld [vmem:[%s821_s2 + $0x8] sm:$0xff]   ;;  %v653_v9 = vld [vmem:[%s819_s1 + $0x30] sm:$0xff]  }
   0x4   :  { %585 = vmatprep.subr.bf16.mxu0 %v648_v1  ;;  %v663_v7 = vld [vmem:[%s821_s2] sm:$0xff]   ;;  %v665_v10 = vld [vmem:[%s821_s2 + $0x10] sm:$0xff]   ;;  %v654_v11 = vld [vmem:[%s819_s1 + $0x38] sm:$0xff]  }
   0x5   :  { %615 = vmatprep.subr.bf16.mxu1 %v663_v7  ;;  %v666_v12 = vld [vmem:[%s821_s2 + $0x18] sm:$0xff]   ;;  %v667_v13 = vld [vmem:[%s821_s2 + $0x20] sm:$0xff]   ;;  %v656_v14 = vld [vmem:[%s820_s0 + $0x8] sm:$0xff]  }
   0x6   :  { %616 = vmatpush3.bf16.msra.mxu1 %v663_v7  ;;  %v657_v15 = vld [vmem:[%s820_s0 + $0x10] sm:$0xff]   ;;  %v668_v16 = vld [vmem:[%s821_s2 + $0x28] sm:$0xff]   ;;  %v658_v18 = vld [vmem:[%s820_s0 + $0x18] sm:$0xff]  }
   0x7   :  { %586 = vmatpush3.bf16.msra.mxu0 %v648_v1  ;;  %617 = vmatprep.subr.bf16.mxu1 %v664_v8  ;;  %v669_v17 = vld [vmem:[%s821_s2 + $0x30] sm:$0xff]   ;;  %v659_v19 = vld [vmem:[%s820_s0 + $0x20] sm:$0xff]   ;;  %v660_v20 = vld [vmem:[%s820_s0 + $0x28] sm:$0xff]  }
   0x8   :  { %587 = vmatprep.subr.bf16.mxu0 %v649_v2  ;;  %v661_v21 = vld [vmem:[%s820_s0 + $0x30] sm:$0xff]   ;;  %v662_v22 = vld [vmem:[%s820_s0 + $0x38] sm:$0xff]   ;;  %v542_v48 = vld [vmem:[%s822_s3] ss:$0 sm:$0xff] }
   0x9   :  { %v670_v23 = vld [vmem:[%s821_s2 + $0x38] sm:$0xff]  }
   0xa   :  { %618 = vmatpush3.bf16.msra.mxu1 %v664_v8 }
   0xb   :  { %588 = vmatpush3.bf16.msra.mxu0 %v649_v2  ;;  %619 = vmatprep.subr.bf16.mxu1 %v665_v10 }
   0xc   :  { %589 = vmatprep.subr.bf16.mxu0 %v650_v3 }
   0xe   :  { %620 = vmatpush3.bf16.msra.mxu1 %v665_v10 }
   0xf   :  { %590 = vmatpush3.bf16.msra.mxu0 %v650_v3  ;;  %621 = vmatprep.subr.bf16.mxu1 %v666_v12 }
  0x10   :  { %591 = vmatprep.subr.bf16.mxu0 %v651_v5 }
  0x12   :  { %622 = vmatpush3.bf16.msra.mxu1 %v666_v12 }
  0x13   :  { %592 = vmatpush3.bf16.msra.mxu0 %v651_v5  ;;  %623 = vmatprep.subr.bf16.mxu1 %v667_v13 }
  0x14   :  { %593 = vmatprep.subr.bf16.mxu0 %v652_v6 }
  0x16   :  { %624 = vmatpush3.bf16.msra.mxu1 %v667_v13 }
  0x17   :  { %594 = vmatpush3.bf16.msra.mxu0 %v652_v6  ;;  %625 = vmatprep.subr.bf16.mxu1 %v668_v16 }
  0x18   :  { %595 = vmatprep.subr.bf16.mxu0 %v653_v9 }
  0x1a   :  { %626 = vmatpush3.bf16.msra.mxu1 %v668_v16 }
  0x1b   :  { %596 = vmatpush3.bf16.msra.mxu0 %v653_v9  ;;  %627 = vmatprep.subr.bf16.mxu1 %v669_v17 }
  0x1c   :  { %597 = vmatprep.subr.bf16.mxu0 %v654_v11 }
  0x1e   :  { %628 = vmatpush3.bf16.msra.mxu1 %v669_v17 }
  0x1f   :  { %598 = vmatpush3.bf16.msra.mxu0 %v654_v11  ;;  %629 = vmatprep.subr.bf16.mxu1 %v670_v23 }
  0x22   :  { %600 = vmatmul.mubr.bf16.vlgmr.msra.gmra.mrb[0].mxu0 %v656_v14  ;;  %630 = vmatpush3.bf16.msra.mxu1 %v670_v23 }
  0x23   :  { %603 = vmatprep.mubr.bf16.mxu0 %v657_v15 }
  0x2a   :  { %604 = vmatmul.mubr.bf16.gmra.mrb[4].mxu0 %v658_v18 }
  0x2b   :  { %607 = vmatprep.mubr.bf16.mxu0 %v659_v19 }
  0x32   :  { %608 = vmatmul.mubr.bf16.gmra.mrb[8].mxu0 %v660_v20 }
  0x33   :  { %611 = vmatprep.mubr.bf16.mxu0 %v661_v21 }
  0x3a   :  { %612 = vmatmul.mubr.bf16.gmra.mrb[12].mxu0 %v662_v22 }
  0xf5   :  { %v601_v24 = vpop.f32.mrb[0].mxu0 }
  0xf6   :  { %v216_v25 = vpop.f32.mrb[1].mxu0 }
  0xf7   :  { %v602_v26 = vpop.f32.mrb[2].mxu0 }
  0xf8   :  { %v331_v27 = vpack.c.bf16 %v602_v26, %v601_v24  ;;  %v219_v28 = vpop.f32.mrb[3].mxu0 }
  0xf9   :  { %v330_v29 = vpack.c.bf16 %v219_v28, %v216_v25 }
  0xfb   :  { %631 = vmatprep.mubr.bf16.mxu1 %v330_v29 }
  0xfc   :  { %632 = vmatmul.mubr.bf16.vlgmr.msra.gmra.mrb[0].mxu1 %v331_v27 }
  0xfd   :  { %v605_v30 = vpop.f32.mrb[4].mxu0 }
  0xfe   :  { %v232_v31 = vpop.f32.mrb[5].mxu0 }
  0xff   :  { %v606_v32 = vpop.f32.mrb[6].mxu0 }
 0x100   :  { %v333_v33 = vpack.c.bf16 %v606_v32, %v605_v30  ;;  %v235_v34 = vpop.f32.mrb[7].mxu0 }
 0x101   :  { %v332_v35 = vpack.c.bf16 %v235_v34, %v232_v31 }
 0x103   :  { %635 = vmatprep.mubr.bf16.mxu1 %v332_v35 }
 0x104   :  { %636 = vmatmul.mubr.bf16.gmra.mrb[4].mxu1 %v333_v33 }
 0x105   :  { %v609_v36 = vpop.f32.mrb[8].mxu0 }
 0x106   :  { %v248_v37 = vpop.f32.mrb[9].mxu0 }
 0x107   :  { %v610_v38 = vpop.f32.mrb[10].mxu0 }
 0x108   :  { %v335_v39 = vpack.c.bf16 %v610_v38, %v609_v36  ;;  %v251_v40 = vpop.f32.mrb[11].mxu0 }
 0x109   :  { %v334_v41 = vpack.c.bf16 %v251_v40, %v248_v37 }
 0x10b   :  { %639 = vmatprep.mubr.bf16.mxu1 %v334_v41 }
 0x10c   :  { %640 = vmatmul.mubr.bf16.gmra.mrb[8].mxu1 %v335_v39 }
 0x10d   :  { %v613_v42 = vpop.f32.mrb[12].mxu0 }
 0x10e   :  { %v264_v43 = vpop.f32.mrb[13].mxu0 }
 0x10f   :  { %v614_v44 = vpop.f32.mrb[14].mxu0 }
 0x110   :  { %v337_v45 = vpack.c.bf16 %v614_v44, %v613_v42  ;;  %v267_v46 = vpop.f32.mrb[15].mxu0 }
 0x111   :  { %v336_v47 = vpack.c.bf16 %v267_v46, %v264_v43 }
 0x113   :  { %643 = vmatprep.mubr.bf16.mxu1 %v336_v47 }
 0x114   :  { %644 = vmatmul.mubr.bf16.gmra.mrb[12].mxu1 %v337_v45 }
 0x1cf   :  { %v633_v49 = vpop.f32.mrb[0].mxu1 }
 0x1d0   :  { %v452_v50 = vadd.f32 %v633_v49, %v542_v48  ;;  %v443_v51 = vpop.f32.mrb[1].mxu1 }
 0x1d1   :  { %v444_v52 = vadd.f32 %v542_v48, %v443_v51  ;;  %v634_v53 = vpop.f32.mrb[2].mxu1 }
 0x1d2   :  { %508 = vst [vmem:[%s823_s4 + $0x10] sm:$0xff] %v452_v50  ;;  %v455_v54 = vadd.f32 %v634_v53, %v542_v48  ;;  %v446_v55 = vpop.f32.mrb[3].mxu1 }
 0x1d3   :  { %506 = vst [vmem:[%s823_s4] sm:$0xff] %v444_v52  ;;  %v447_v56 = vadd.f32 %v542_v48, %v446_v55 }
 0x1d4   :  { %509 = vst [vmem:[%s823_s4 + $0x18] sm:$0xff] %v455_v54 }
 0x1d5   :  { %507 = vst [vmem:[%s823_s4 + $0x8] sm:$0xff] %v447_v56 }
 0x1d7   :  { %v637_v57 = vpop.f32.mrb[4].mxu1 }
 0x1d8   :  { %v468_v58 = vadd.f32 %v637_v57, %v542_v48  ;;  %v459_v59 = vpop.f32.mrb[5].mxu1 }
 0x1d9   :  { %v460_v60 = vadd.f32 %v542_v48, %v459_v59  ;;  %v638_v61 = vpop.f32.mrb[6].mxu1 }
 0x1da   :  { %512 = vst [vmem:[%s823_s4 + $0x30] sm:$0xff] %v468_v58  ;;  %v471_v62 = vadd.f32 %v638_v61, %v542_v48  ;;  %v462_v63 = vpop.f32.mrb[7].mxu1 }
 0x1db   :  { %510 = vst [vmem:[%s823_s4 + $0x20] sm:$0xff] %v460_v60  ;;  %v463_v0 = vadd.f32 %v542_v48, %v462_v63 }
 0x1dc   :  { %513 = vst [vmem:[%s823_s4 + $0x38] sm:$0xff] %v471_v62 }
 0x1dd   :  { %511 = vst [vmem:[%s823_s4 + $0x28] sm:$0xff] %v463_v0 }
 0x1df   :  { %v641_v1 = vpop.f32.mrb[8].mxu1 }
 0x1e0   :  { %v484_v2 = vadd.f32 %v641_v1, %v542_v48  ;;  %v475_v3 = vpop.f32.mrb[9].mxu1 }
 0x1e1   :  { %v476_v4 = vadd.f32 %v542_v48, %v475_v3  ;;  %v642_v5 = vpop.f32.mrb[10].mxu1 }
 0x1e2   :  { %516 = vst [vmem:[%s823_s4 + $0x50] sm:$0xff] %v484_v2  ;;  %v487_v6 = vadd.f32 %v642_v5, %v542_v48  ;;  %v478_v7 = vpop.f32.mrb[11].mxu1 }
 0x1e3   :  { %514 = vst [vmem:[%s823_s4 + $0x40] sm:$0xff] %v476_v4  ;;  %v479_v8 = vadd.f32 %v542_v48, %v478_v7 }
 0x1e4   :  { %517 = vst [vmem:[%s823_s4 + $0x58] sm:$0xff] %v487_v6 }
 0x1e5   :  { %515 = vst [vmem:[%s823_s4 + $0x48] sm:$0xff] %v479_v8 }
 0x1e7   :  { %v645_v9 = vpop.f32.mrb[12].mxu1 }
 0x1e8   :  { %v500_v10 = vadd.f32 %v645_v9, %v542_v48  ;;  %v491_v11 = vpop.f32.mrb[13].mxu1 }
 0x1e9   :  { %v492_v12 = vadd.f32 %v542_v48, %v491_v11  ;;  %v646_v13 = vpop.f32.mrb[14].mxu1 }
 0x1ea   :  { %520 = vst [vmem:[%s823_s4 + $0x70] sm:$0xff] %v500_v10  ;;  %v503_v14 = vadd.f32 %v646_v13, %v542_v48  ;;  %v494_v15 = vpop.f32.mrb[15].mxu1 }
 0x1eb   :  { %518 = vst [vmem:[%s823_s4 + $0x60] sm:$0xff] %v492_v12  ;;  %v495_v16 = vadd.f32 %v542_v48, %v494_v15 }
 0x1ec   :  { %521 = vst [vmem:[%s823_s4 + $0x78] sm:$0xff] %v503_v14 }
 0x1ed   :  { %519 = vst [vmem:[%s823_s4 + $0x68] sm:$0xff] %v495_v16 }

// kernel: node_cls_head_forward.2
= control target key start
LH: loop header
LB: loop body
LE: loop exit
PB: predicated region body
PF: predicated region fallthrough
CT: control target
= control target key end

     0   :  { %s954_s1 = inlined_call_operand.vmem [shape: bf16[128,128], index: 1, kind: input, shape index: {}]   ;;  %s955_s0 = inlined_call_operand.vmem [shape: bf16[128,128], index: 0, kind: input, shape index: {}]   ;;  %s956_s2 = inlined_call_operand.vmem [shape: bf16[128,128], index: 2, kind: input, shape index: {}]   ;;  %s957_s3 = inlined_call_operand.vmem [shape: f32[1,128], index: 3, kind: input, shape index: {}]   ;;  %s958_s4 = inlined_call_operand.vmem [shape: bf16[128,128], index: 4, kind: output, shape index: {}]  }
   0x1   :  { %v806_v0 = vld [vmem:[%s954_s1] sm:$0xff]   ;;  %v807_v1 = vld [vmem:[%s954_s1 + $0x8] sm:$0xff]   ;;  %v808_v2 = vld [vmem:[%s954_s1 + $0x10] sm:$0xff]  }
   0x2   :  { %742 = vmatprep.subr.bf16.mxu0 %v806_v0  ;;  %v809_v3 = vld [vmem:[%s954_s1 + $0x18] sm:$0xff]   ;;  %v814_v4 = vld [vmem:[%s955_s0] sm:$0xff]   ;;  %v811_v6 = vld [vmem:[%s954_s1 + $0x28] sm:$0xff]  }
   0x3   :  { %743 = vmatpush3.bf16.msra.mxu0 %v806_v0  ;;  %758 = vmatprep.mubr.bf16.mxu0 %v814_v4  ;;  %v810_v5 = vld [vmem:[%s954_s1 + $0x20] sm:$0xff]   ;;  %v823_v8 = vld [vmem:[%s956_s2 + $0x8] sm:$0xff]   ;;  %v812_v9 = vld [vmem:[%s954_s1 + $0x30] sm:$0xff]  }
   0x4   :  { %744 = vmatprep.subr.bf16.mxu0 %v807_v1  ;;  %v822_v7 = vld [vmem:[%s956_s2] sm:$0xff]   ;;  %v824_v10 = vld [vmem:[%s956_s2 + $0x10] sm:$0xff]   ;;  %v813_v11 = vld [vmem:[%s954_s1 + $0x38] sm:$0xff]  }
   0x5   :  { %774 = vmatprep.subr.bf16.mxu1 %v822_v7  ;;  %v825_v12 = vld [vmem:[%s956_s2 + $0x18] sm:$0xff]   ;;  %v826_v13 = vld [vmem:[%s956_s2 + $0x20] sm:$0xff]   ;;  %v815_v14 = vld [vmem:[%s955_s0 + $0x8] sm:$0xff]  }
   0x6   :  { %775 = vmatpush3.bf16.msra.mxu1 %v822_v7  ;;  %v816_v15 = vld [vmem:[%s955_s0 + $0x10] sm:$0xff]   ;;  %v827_v16 = vld [vmem:[%s956_s2 + $0x28] sm:$0xff]   ;;  %v817_v18 = vld [vmem:[%s955_s0 + $0x18] sm:$0xff]  }
   0x7   :  { %745 = vmatpush3.bf16.msra.mxu0 %v807_v1  ;;  %776 = vmatprep.subr.bf16.mxu1 %v823_v8  ;;  %v828_v17 = vld [vmem:[%s956_s2 + $0x30] sm:$0xff]   ;;  %v818_v19 = vld [vmem:[%s955_s0 + $0x20] sm:$0xff]   ;;  %v819_v20 = vld [vmem:[%s955_s0 + $0x28] sm:$0xff]  }
   0x8   :  { %746 = vmatprep.subr.bf16.mxu0 %v808_v2  ;;  %v820_v21 = vld [vmem:[%s955_s0 + $0x30] sm:$0xff]   ;;  %v821_v22 = vld [vmem:[%s955_s0 + $0x38] sm:$0xff]   ;;  %v622_v48 = vld [vmem:[%s957_s3] ss:$0 sm:$0xff] }
   0x9   :  { %v829_v23 = vld [vmem:[%s956_s2 + $0x38] sm:$0xff]  }
   0xa   :  { %777 = vmatpush3.bf16.msra.mxu1 %v823_v8 }
   0xb   :  { %747 = vmatpush3.bf16.msra.mxu0 %v808_v2  ;;  %778 = vmatprep.subr.bf16.mxu1 %v824_v10 }
   0xc   :  { %748 = vmatprep.subr.bf16.mxu0 %v809_v3 }
   0xe   :  { %779 = vmatpush3.bf16.msra.mxu1 %v824_v10 }
   0xf   :  { %749 = vmatpush3.bf16.msra.mxu0 %v809_v3  ;;  %780 = vmatprep.subr.bf16.mxu1 %v825_v12 }
  0x10   :  { %750 = vmatprep.subr.bf16.mxu0 %v810_v5 }
  0x12   :  { %781 = vmatpush3.bf16.msra.mxu1 %v825_v12 }
  0x13   :  { %751 = vmatpush3.bf16.msra.mxu0 %v810_v5  ;;  %782 = vmatprep.subr.bf16.mxu1 %v826_v13 }
  0x14   :  { %752 = vmatprep.subr.bf16.mxu0 %v811_v6 }
  0x16   :  { %783 = vmatpush3.bf16.msra.mxu1 %v826_v13 }
  0x17   :  { %753 = vmatpush3.bf16.msra.mxu0 %v811_v6  ;;  %784 = vmatprep.subr.bf16.mxu1 %v827_v16 }
  0x18   :  { %754 = vmatprep.subr.bf16.mxu0 %v812_v9 }
  0x1a   :  { %785 = vmatpush3.bf16.msra.mxu1 %v827_v16 }
  0x1b   :  { %755 = vmatpush3.bf16.msra.mxu0 %v812_v9  ;;  %786 = vmatprep.subr.bf16.mxu1 %v828_v17 }
  0x1c   :  { %756 = vmatprep.subr.bf16.mxu0 %v813_v11 }
  0x1e   :  { %787 = vmatpush3.bf16.msra.mxu1 %v828_v17 }
  0x1f   :  { %757 = vmatpush3.bf16.msra.mxu0 %v813_v11  ;;  %788 = vmatprep.subr.bf16.mxu1 %v829_v23 }
  0x22   :  { %759 = vmatmul.mubr.bf16.vlgmr.msra.gmra.mrb[0].mxu0 %v815_v14  ;;  %789 = vmatpush3.bf16.msra.mxu1 %v829_v23 }
  0x23   :  { %762 = vmatprep.mubr.bf16.mxu0 %v816_v15 }
  0x2a   :  { %763 = vmatmul.mubr.bf16.gmra.mrb[4].mxu0 %v817_v18 }
  0x2b   :  { %766 = vmatprep.mubr.bf16.mxu0 %v818_v19 }
  0x32   :  { %767 = vmatmul.mubr.bf16.gmra.mrb[8].mxu0 %v819_v20 }
  0x33   :  { %770 = vmatprep.mubr.bf16.mxu0 %v820_v21 }
  0x3a   :  { %771 = vmatmul.mubr.bf16.gmra.mrb[12].mxu0 %v821_v22 }
  0xf5   :  { %v760_v24 = vpop.f32.mrb[0].mxu0 }
  0xf6   :  { %v216_v25 = vpop.f32.mrb[1].mxu0 }
  0xf7   :  { %v761_v26 = vpop.f32.mrb[2].mxu0 }
  0xf8   :  { %v331_v27 = vpack.c.bf16 %v761_v26, %v760_v24  ;;  %v219_v28 = vpop.f32.mrb[3].mxu0 }
  0xf9   :  { %v330_v29 = vpack.c.bf16 %v219_v28, %v216_v25 }
  0xfb   :  { %790 = vmatprep.mubr.bf16.mxu1 %v330_v29 }
  0xfc   :  { %791 = vmatmul.mubr.bf16.vlgmr.msra.gmra.mrb[0].mxu1 %v331_v27 }
  0xfd   :  { %v764_v30 = vpop.f32.mrb[4].mxu0 }
  0xfe   :  { %v232_v31 = vpop.f32.mrb[5].mxu0 }
  0xff   :  { %v765_v32 = vpop.f32.mrb[6].mxu0 }
 0x100   :  { %v333_v33 = vpack.c.bf16 %v765_v32, %v764_v30  ;;  %v235_v34 = vpop.f32.mrb[7].mxu0 }
 0x101   :  { %v332_v35 = vpack.c.bf16 %v235_v34, %v232_v31 }
 0x103   :  { %794 = vmatprep.mubr.bf16.mxu1 %v332_v35 }
 0x104   :  { %795 = vmatmul.mubr.bf16.gmra.mrb[4].mxu1 %v333_v33 }
 0x105   :  { %v768_v36 = vpop.f32.mrb[8].mxu0 }
 0x106   :  { %v248_v37 = vpop.f32.mrb[9].mxu0 }
 0x107   :  { %v769_v38 = vpop.f32.mrb[10].mxu0 }
 0x108   :  { %v335_v39 = vpack.c.bf16 %v769_v38, %v768_v36  ;;  %v251_v40 = vpop.f32.mrb[11].mxu0 }
 0x109   :  { %v334_v41 = vpack.c.bf16 %v251_v40, %v248_v37 }
 0x10b   :  { %798 = vmatprep.mubr.bf16.mxu1 %v334_v41 }
 0x10c   :  { %799 = vmatmul.mubr.bf16.gmra.mrb[8].mxu1 %v335_v39 }
 0x10d   :  { %v772_v42 = vpop.f32.mrb[12].mxu0 }
 0x10e   :  { %v264_v43 = vpop.f32.mrb[13].mxu0 }
 0x10f   :  { %v773_v44 = vpop.f32.mrb[14].mxu0 }
 0x110   :  { %v337_v45 = vpack.c.bf16 %v773_v44, %v772_v42  ;;  %v267_v46 = vpop.f32.mrb[15].mxu0 }
 0x111   :  { %v336_v47 = vpack.c.bf16 %v267_v46, %v264_v43 }
 0x113   :  { %802 = vmatprep.mubr.bf16.mxu1 %v336_v47 }
 0x114   :  { %803 = vmatmul.mubr.bf16.gmra.mrb[12].mxu1 %v337_v45 }
 0x1cf   :  { %v792_v49 = vpop.f32.mrb[0].mxu1 }
 0x1d0   :  { %v452_v50 = vadd.f32 %v792_v49, %v622_v48  ;;  %v443_v51 = vpop.f32.mrb[1].mxu1 }
 0x1d1   :  { %v444_v52 = vadd.f32 %v622_v48, %v443_v51  ;;  %v793_v53 = vpop.f32.mrb[2].mxu1 }
 0x1d2   :  { %v455_v54 = vadd.f32 %v793_v53, %v622_v48  ;;  %v446_v55 = vpop.f32.mrb[3].mxu1  ;;  %v508_v57 = vmax.f32 %v452_v50, 0.0 }
 0x1d3   :  { %v447_v56 = vadd.f32 %v622_v48, %v446_v55  ;;  %v506_v59 = vmax.f32 %v444_v52, 0.0 }
 0x1d4   :  { %v509_v58 = vmax.f32 %v455_v54, 0.0 }
 0x1d5   :  { %v507_v60 = vmax.f32 %v447_v56, 0.0 }
 0x1d6   :  { %v671_v61 = vpack.c.bf16 %v509_v58, %v508_v57 }
 0x1d7   :  { %v666_v62 = vpack.c.bf16 %v507_v60, %v506_v59  ;;  %v796_v63 = vpop.f32.mrb[4].mxu1 }
 0x1d8   :  { %703 = vst [vmem:[%s958_s4 + $0x8] sm:$0xff] %v671_v61   ;;  %v468_v0 = vadd.f32 %v796_v63, %v622_v48  ;;  %v459_v1 = vpop.f32.mrb[5].mxu1 }
 0x1d9   :  { %667 = vst [vmem:[%s958_s4] sm:$0xff] %v666_v62   ;;  %v460_v2 = vadd.f32 %v622_v48, %v459_v1  ;;  %v797_v3 = vpop.f32.mrb[6].mxu1 }
 0x1da   :  { %v471_v4 = vadd.f32 %v797_v3, %v622_v48  ;;  %v462_v5 = vpop.f32.mrb[7].mxu1  ;;  %v512_v7 = vmax.f32 %v468_v0, 0.0 }
 0x1db   :  { %v463_v6 = vadd.f32 %v622_v48, %v462_v5  ;;  %v510_v9 = vmax.f32 %v460_v2, 0.0 }
 0x1dc   :  { %v513_v8 = vmax.f32 %v471_v4, 0.0 }
 0x1dd   :  { %v511_v10 = vmax.f32 %v463_v6, 0.0 }
 0x1de   :  { %v681_v11 = vpack.c.bf16 %v513_v8, %v512_v7 }
 0x1df   :  { %v676_v12 = vpack.c.bf16 %v511_v10, %v510_v9  ;;  %v800_v13 = vpop.f32.mrb[8].mxu1 }
 0x1e0   :  { %705 = vst [vmem:[%s958_s4 + $0x18] sm:$0xff] %v681_v11   ;;  %v484_v14 = vadd.f32 %v800_v13, %v622_v48  ;;  %v475_v15 = vpop.f32.mrb[9].mxu1 }
 0x1e1   :  { %704 = vst [vmem:[%s958_s4 + $0x10] sm:$0xff] %v676_v12   ;;  %v476_v16 = vadd.f32 %v622_v48, %v475_v15  ;;  %v801_v17 = vpop.f32.mrb[10].mxu1 }
 0x1e2   :  { %v487_v18 = vadd.f32 %v801_v17, %v622_v48  ;;  %v478_v19 = vpop.f32.mrb[11].mxu1  ;;  %v516_v21 = vmax.f32 %v484_v14, 0.0 }
 0x1e3   :  { %v479_v20 = vadd.f32 %v622_v48, %v478_v19  ;;  %v514_v23 = vmax.f32 %v476_v16, 0.0 }
 0x1e4   :  { %v517_v22 = vmax.f32 %v487_v18, 0.0 }
 0x1e5   :  { %v515_v24 = vmax.f32 %v479_v20, 0.0 }
 0x1e6   :  { %v691_v25 = vpack.c.bf16 %v517_v22, %v516_v21 }
 0x1e7   :  { %v686_v26 = vpack.c.bf16 %v515_v24, %v514_v23  ;;  %v804_v27 = vpop.f32.mrb[12].mxu1 }
 0x1e8   :  { %707 = vst [vmem:[%s958_s4 + $0x28] sm:$0xff] %v691_v25   ;;  %v500_v28 = vadd.f32 %v804_v27, %v622_v48  ;;  %v491_v29 = vpop.f32.mrb[13].mxu1 }
 0x1e9   :  { %706 = vst [vmem:[%s958_s4 + $0x20] sm:$0xff] %v686_v26   ;;  %v492_v30 = vadd.f32 %v622_v48, %v491_v29  ;;  %v805_v31 = vpop.f32.mrb[14].mxu1 }
 0x1ea   :  { %v503_v32 = vadd.f32 %v805_v31, %v622_v48  ;;  %v494_v33 = vpop.f32.mrb[15].mxu1  ;;  %v520_v35 = vmax.f32 %v500_v28, 0.0 }
 0x1eb   :  { %v495_v34 = vadd.f32 %v622_v48, %v494_v33  ;;  %v518_v37 = vmax.f32 %v492_v30, 0.0 }
 0x1ec   :  { %v521_v36 = vmax.f32 %v503_v32, 0.0 }
 0x1ed   :  { %v519_v38 = vmax.f32 %v495_v34, 0.0 }
 0x1ee   :  { %v701_v39 = vpack.c.bf16 %v521_v36, %v520_v35 }
 0x1ef   :  { %v696_v40 = vpack.c.bf16 %v519_v38, %v518_v37 }
 0x1f0   :  { %709 = vst [vmem:[%s958_s4 + $0x38] sm:$0xff] %v701_v39  }
 0x1f1   :  { %708 = vst [vmem:[%s958_s4 + $0x30] sm:$0xff] %v696_v40  }

</bundles_post_ra>
